<compile_context>
chip_gen: v6e
topology: v6e:2x2x1
jax: 0.10.0
libtpu: 0.0.40
codegen_flags: <defaults>
</compile_context>

<pallas_src>
import functools

import jax
import jax.numpy as jnp
from jax.experimental import pallas as pl
from jax.experimental.pallas import tpu as pltpu


def _quadratic_cost_kernel(state_ref, a_state_ref, control_ref, a_control_ref,
                           out_ref, *, step_size):
    # state_ref:     (TB, Ns)  VMEM, streamed (native dtype: f32 or bf16)
    # a_state_ref:   (Ns, Ns)  VMEM, grid-resident (constant index_map)
    # control_ref:   (TB, Nc)  VMEM, streamed
    # a_control_ref: (Nc, Nc)  VMEM, grid-resident
    # out_ref:       (1, TB)   VMEM, lane-dense cost row (f32)
    s = state_ref[...]
    u = control_ref[...]

    # MXU matmuls, operands in native dtype, f32 accumulation.
    sA = jnp.dot(s, a_state_ref[...], preferred_element_type=jnp.float32)
    uA = jnp.dot(u, a_control_ref[...], preferred_element_type=jnp.float32)

    # Per-row quadratic forms: VPU multiply (promotes to f32) + XLU lane reduce.
    state_cost = jnp.sum(sA * s, axis=-1)        # (TB,)
    control_cost = jnp.sum(uA * u, axis=-1)      # (TB,)

    total = step_size * (state_cost + control_cost)
    # Lane-dense store: one (1, TB) row -> unmasked vector stores.
    out_ref[...] = total.reshape(1, -1).astype(out_ref.dtype)


def _choose_batch_tile(B):
    """Lane-dense batch tile: multiple of 128 with >= 2 grid steps when
    possible (pipelining + v7x megacore sharding), capped at 1024 rows so
    double-buffered, lane-padded f32 tiles stay ~2 MiB -> inside scoped-VMEM
    defaults on v5e/v6e/v7x."""
    if B % 128 != 0:
        return B  # tiny / ragged batch: single full-extent tile
    for tb in (1024, 512, 256, 128):
        if B % tb == 0 and B // tb >= 2:
            return tb
    return B


def quadratic_cost(state, control, a_state, a_control, step_size, *,
                   batch_tile=None):
    """step_size * (state^T A_s state + control^T A_c control), per batch row."""
    B, Ns = state.shape
    Bc, Nc = control.shape
    assert B == Bc, "state / control batch mismatch"
    assert a_state.shape == (Ns, Ns)
    assert a_control.shape == (Nc, Nc)

    tb = _choose_batch_tile(B) if batch_tile is None else int(batch_tile)
    assert B % tb == 0, "batch must be a multiple of the batch tile (pad B)"
    assert tb == B or tb % 128 == 0, \
        "batch_tile must equal B or be a multiple of 128 (lane-dense tiles)"

    # Hoist the A dtype cast out of the kernel: keep A in the streamed dtype so
    # no per-grid-step VPU cast runs on the resident blocks.
    a_state = a_state.astype(state.dtype)
    a_control = a_control.astype(control.dtype)

    kernel = functools.partial(_quadratic_cost_kernel, step_size=float(step_size))

    out_row = pl.pallas_call(
        kernel,
        out_shape=jax.ShapeDtypeStruct((1, B), jnp.float32),
        grid_spec=pltpu.PrefetchScalarGridSpec(
            num_scalar_prefetch=0,
            grid=(B // tb,),
            in_specs=[
                pl.BlockSpec((tb, Ns), lambda i: (i, 0)),   # state tile (streamed)
                pl.BlockSpec((Ns, Ns), lambda i: (0, 0)),   # A_state (resident)
                pl.BlockSpec((tb, Nc), lambda i: (i, 0)),   # control tile (streamed)
                pl.BlockSpec((Nc, Nc), lambda i: (0, 0)),   # A_control (resident)
            ],
            out_specs=pl.BlockSpec((1, tb), lambda i: (0, i)),  # lane-dense row
        ),
        compiler_params=pltpu.CompilerParams(
            dimension_semantics=("parallel",),
        ),
    )(state, a_state, control, a_control)

    return out_row.reshape(B, 1)   # free reshape (1,B) -> (B,1)


def _symmetrize(m):
    return 0.5 * (m + m.T)


def _reference(state, control, a_state, a_control, step_size):
    s_cost = jnp.einsum("bi,ij,bj->b", state, a_state, state)
    c_cost = jnp.einsum("bi,ij,bj->b", control, a_control, control)
    return (step_size * (s_cost + c_cost))[:, None]


if __name__ == "__main__":
    key = jax.random.PRNGKey(0)
    k1, k2, k3, k4 = jax.random.split(key, 4)

    N_STATE, N_CONTROL = 32, 16
    STEP_SIZE = 0.1

    # Deterministic synthetic parameters (symmetric quadratic-form matrices).
    a_state = _symmetrize(jax.random.normal(k1, (N_STATE, N_STATE), jnp.float32))
    a_control = _symmetrize(jax.random.normal(k2, (N_CONTROL, N_CONTROL), jnp.float32))

    # --- Case 1: small f32 batch (single full-extent tile) ----------------
    B = 8
    state = jax.random.normal(k3, (B, N_STATE), jnp.float32)
    control = jax.random.normal(k4, (B, N_CONTROL), jnp.float32)

    out = jax.block_until_ready(
        quadratic_cost(state, control, a_state, a_control, STEP_SIZE))
    ref = _reference(state, control, a_state, a_control, STEP_SIZE)
    assert out.shape == (B, 1)
    assert jnp.allclose(out, ref, rtol=1e-5, atol=1e-5), (out, ref)

    # --- Case 2: bf16 streaming + real tiling (grid=2, 128-row tiles) ------
    B2 = 256
    state2 = jax.random.normal(k3, (B2, N_STATE), jnp.bfloat16)
    control2 = jax.random.normal(k4, (B2, N_CONTROL), jnp.bfloat16)

    out2 = jax.block_until_ready(
        quadratic_cost(state2, control2, a_state, a_control, STEP_SIZE))
    ref2 = _reference(state2.astype(jnp.float32), control2.astype(jnp.float32),
                      a_state, a_control, STEP_SIZE)
    assert out2.shape == (B2, 1)
    assert jnp.allclose(out2, ref2, rtol=5e-2, atol=5e-2), (out2, ref2)

    print("KERNEL_OK")
</pallas_src>

<mosaic_0001>
module attributes {stable_mosaic.version = 11 : i64} {
  func.func @_quadratic_cost_kernel(%arg0: i32, %arg1: memref<8x32xf32, #tpu.memory_space<vmem>>, %arg2: memref<32x32xf32, #tpu.memory_space<vmem>>, %arg3: memref<8x16xf32, #tpu.memory_space<vmem>>, %arg4: memref<16x16xf32, #tpu.memory_space<vmem>>, %arg5: memref<1x8xf32, #tpu.memory_space<vmem>>) attributes {dimension_semantics = [#tpu.dimension_semantics<parallel>], iteration_bounds = array<i64: 1>, scalar_prefetch = 0 : i64, scratch_operands = 0 : i64, tpu.core_type = #tpu.core_type<tc>, window_params = [{transform_indices = @transform_0, window_bounds = array<i64: 8, 32>}, {pipeline_mode = #tpu.pipeline_mode<synchronous>, transform_indices = @transform_1, window_bounds = array<i64: 32, 32>}, {transform_indices = @transform_2, window_bounds = array<i64: 8, 16>}, {pipeline_mode = #tpu.pipeline_mode<synchronous>, transform_indices = @transform_3, window_bounds = array<i64: 16, 16>}, {transform_indices = @transform_4, window_bounds = array<i64: 1, 8>}]} {
    %c0 = arith.constant 0 : index
    %c0_0 = arith.constant 0 : index
    %0 = vector.load %arg1[%c0, %c0_0] : memref<8x32xf32, #tpu.memory_space<vmem>>, vector<8x32xf32>
    %c0_1 = arith.constant 0 : index
    %c0_2 = arith.constant 0 : index
    %1 = vector.load %arg3[%c0_1, %c0_2] : memref<8x16xf32, #tpu.memory_space<vmem>>, vector<8x16xf32>
    %c0_3 = arith.constant 0 : index
    %c0_4 = arith.constant 0 : index
    %2 = vector.load %arg2[%c0_3, %c0_4] : memref<32x32xf32, #tpu.memory_space<vmem>>, vector<32x32xf32>
    %cst = arith.constant dense<0.000000e+00> : vector<8x32xf32>
    %3 = tpu.matmul %0, %2, %cst {dimension_numbers = #tpu.dot_dimension_numbers<[1], [0], [0], [1], [0, 0, 1, 1], [], []>} : vector<8x32xf32>, vector<32x32xf32>, vector<8x32xf32> -> vector<8x32xf32>
    %c0_5 = arith.constant 0 : index
    %c0_6 = arith.constant 0 : index
    %4 = vector.load %arg4[%c0_5, %c0_6] : memref<16x16xf32, #tpu.memory_space<vmem>>, vector<16x16xf32>
    %cst_7 = arith.constant dense<0.000000e+00> : vector<8x16xf32>
    %5 = tpu.matmul %1, %4, %cst_7 {dimension_numbers = #tpu.dot_dimension_numbers<[1], [0], [0], [1], [0, 0, 1, 1], [], []>} : vector<8x16xf32>, vector<16x16xf32>, vector<8x16xf32> -> vector<8x16xf32>
    %6 = arith.mulf %3, %0 : vector<8x32xf32>
    %cst_8 = arith.constant dense<0.000000e+00> : vector<8xf32>
    %7 = vector.multi_reduction <add>, %6, %cst_8 [1] : vector<8x32xf32> to vector<8xf32>
    %8 = arith.mulf %5, %1 : vector<8x16xf32>
    %cst_9 = arith.constant dense<0.000000e+00> : vector<8xf32>
    %9 = vector.multi_reduction <add>, %8, %cst_9 [1] : vector<8x16xf32> to vector<8xf32>
    %10 = arith.addf %7, %9 : vector<8xf32>
    %cst_10 = arith.constant 1.000000e-01 : f32
    %11 = vector.broadcast %cst_10 : f32 to vector<8xf32>
    %12 = arith.mulf %11, %10 : vector<8xf32>
    %13 = vector.shape_cast %12 : vector<8xf32> to vector<1x8xf32>
    %c0_11 = arith.constant 0 : index
    %c0_12 = arith.constant 0 : index
    %14 = vector.load %arg5[%c0_11, %c0_12] : memref<1x8xf32, #tpu.memory_space<vmem>>, vector<1x8xf32>
    tpu.vector_store %arg5[%c0_11, %c0_12], %13 {strides = array<i32>} : memref<1x8xf32, #tpu.memory_space<vmem>>, vector<1x8xf32>,
    return
  }
  func.func @transform_0(%arg0: i32) -> (i32, i32) {
    %c0_i32 = arith.constant 0 : i32
    %c0_i32_0 = arith.constant 0 : i32
    return %arg0, %c0_i32 : i32, i32
  }
  func.func @transform_1(%arg0: i32) -> (i32, i32) {
    %c0_i32 = arith.constant 0 : i32
    %c0_i32_0 = arith.constant 0 : i32
    %c0_i32_1 = arith.constant 0 : i32
    return %c0_i32, %c0_i32_0 : i32, i32
  }
  func.func @transform_2(%arg0: i32) -> (i32, i32) {
    %c0_i32 = arith.constant 0 : i32
    %c0_i32_0 = arith.constant 0 : i32
    return %arg0, %c0_i32 : i32, i32
  }
  func.func @transform_3(%arg0: i32) -> (i32, i32) {
    %c0_i32 = arith.constant 0 : i32
    %c0_i32_0 = arith.constant 0 : i32
    %c0_i32_1 = arith.constant 0 : i32
    return %c0_i32, %c0_i32_0 : i32, i32
  }
  func.func @transform_4(%arg0: i32) -> (i32, i32) {
    %c0_i32 = arith.constant 0 : i32
    %c0_i32_0 = arith.constant 0 : i32
    return %c0_i32, %arg0 : i32, i32
  }
}

</mosaic_0001>

<bundles_post_ra>
// kernel: tpu_custom_call.1
= control target key start
LH: loop header
LB: loop body
LE: loop exit
PB: predicated region body
PF: predicated region fallthrough
CT: control target
= control target key end

     0   :  { %9 = vsyncpa [#allocation3], 0  ;;  %s464_s0 = inlined_call_operand.hbm [shape: f32[8,32], index: 0, kind: input, shape index: {}]   ;;  %s465_s1 = inlined_call_operand.hbm [shape: f32[32,32], index: 1, kind: input, shape index: {}]   ;;  %s466_s2 = inlined_call_operand.hbm [shape: f32[8,16], index: 2, kind: input, shape index: {}]   ;;  %s467_s3 = inlined_call_operand.hbm [shape: f32[16,16], index: 3, kind: input, shape index: {}]   ;;  %s468_s4 = inlined_call_operand.hbm [shape: f32[1,8], index: 4, kind: output, shape index: {}]  }
   0x1   :  { %10 = vsyncpa [#allocation6], 0 }
   0x2   :  { %11 = vsyncpa [#allocation9], 0 }
   0x3   :  { %12 = vsyncpa [#allocation4], 0  ;;  %s407_s15 = smov [#allocation5]  }
   0x4   :  { %s28_s16 = sshll.u32 %s407_s15, 4  ;;  %s29_s16 = int_to_ptr.vmem [resolvable:$true] %s28_s16 }
   0x5   :  { %s307_s17 = scalar_lea.vmem %s29_s16, 512  ;;  %p312_p1 = scmp.lt.s32.totalorder %s29_s16, %s29_s16 }
   0x6   :  { %p308_p0 = scmp.ne.s32.totalorder %s29_s16, %s307_s17  ;;  %p313_p2 = scmp.lt.s32.totalorder %s307_s17, %s307_s17 }
   0x8   :  { %p314_p3 = por %p313_p2, %p312_p1 }
   0xa   :  { %p315_p4 = pnand %p314_p3, %p308_p0 }
   0xc   :  { %318 = shalt.err (!%p315_p4)
}
   0xd   :  { %s408_s18 = smov 128   ;;  %s409_s19 = smov 8  }
   0xe   :  { %34 = dma.hbm_to_vmem [thread:$0]  %s465_s1, 512, %s29_s16, [#allocation6], %s408_s18, %s408_s18, %s409_s19  }
   0xf   :  { %s410_s22 = smov [#allocation2]   ;;  %s411_s24 = smov [#allocation7]  }
  0x10   :  { %s19_s23 = sshll.u32 %s410_s22, 4  ;;  %s41_s25 = sshll.u32 %s411_s24, 4  ;;  %s20_s23 = int_to_ptr.vmem [resolvable:$true] %s19_s23  ;;  %s42_s25 = int_to_ptr.vmem [resolvable:$true] %s41_s25 }
  0x11   :  { %s327_s26 = scalar_lea.vmem %s20_s23, 128  ;;  %p332_p6 = scmp.lt.s32.totalorder %s20_s23, %s20_s23 }
  0x12   :  { %p328_p5 = scmp.ne.s32.totalorder %s20_s23, %s327_s26  ;;  %p333_p7 = scmp.lt.s32.totalorder %s327_s26, %s327_s26 }
  0x14   :  { %p334_p8 = por %p333_p7, %p332_p6 }
  0x16   :  { %p335_p9 = pnand %p334_p8, %p328_p5 }
  0x18   :  { %338 = shalt.err (!%p335_p9)
}
  0x19   :  { %22 = dma.hbm_to_vmem [thread:$0]  %s464_s0, 128, %s20_s23, [#allocation3]  }
  0x1a   :  { %s347_s29 = scalar_lea.vmem %s42_s25, 128  ;;  %p352_p11 = scmp.lt.s32.totalorder %s42_s25, %s42_s25 }
  0x1b   :  { %p348_p10 = scmp.ne.s32.totalorder %s42_s25, %s347_s29  ;;  %p353_p12 = scmp.lt.s32.totalorder %s347_s29, %s347_s29 }
  0x1d   :  { %p354_p13 = por %p353_p12, %p352_p11 }
  0x1f   :  { %p355_p0 = pnand %p354_p13, %p348_p10 }
  0x21   :  { %358 = shalt.err (!%p355_p0)
}
  0x22   :  { %44 = dma.hbm_to_vmem [thread:$0]  %s466_s2, 128, %s42_s25, [#allocation6]  }
  0x23   :  { %s412_s5 = smov [#allocation8]  }
  0x24   :  { %s50_s6 = sshll.u32 %s412_s5, 4  ;;  %s51_s6 = int_to_ptr.vmem [resolvable:$true] %s50_s6 }
  0x25   :  { %s367_s7 = scalar_lea.vmem %s51_s6, 256  ;;  %p372_p2 = scmp.lt.s32.totalorder %s51_s6, %s51_s6 }
  0x26   :  { %p368_p1 = scmp.ne.s32.totalorder %s51_s6, %s367_s7  ;;  %p373_p3 = scmp.lt.s32.totalorder %s367_s7, %s367_s7 }
  0x28   :  { %p374_p4 = por %p373_p3, %p372_p2 }
  0x2a   :  { %p375_p5 = pnand %p374_p4, %p368_p1 }
  0x2c   :  { %378 = shalt.err (!%p375_p5)
}
  0x2d   :  { %56 = dma.hbm_to_vmem [thread:$0]  %s467_s3, 256, %s51_s6, [#allocation9], %s408_s18, %s408_s18, %s409_s19  }
  0x2e   :  { %399 = dma.done.wait [#allocation3], 128  }
  0x2f   :  { %400 = vsyncadd [#allocation3], 4294967168 }
  0x30   :  { %401 = dma.done.wait [#allocation6], 640  }
  0x31   :  { %402 = vsyncadd [#allocation6], 4294966656 }
  0x32   :  { %403 = dma.done.wait [#allocation9], 256  }
  0x33   :  { %404 = vsyncadd [#allocation9], 4294967040  ;;  %v413_v0 = vmov 0.0   ;;  %vm414_vm0 = vmmov 0   ;;  %v74_v1 = vld [vmem:[#allocation5 + $0x18] sm:$0xff]  ;;  %v73_v2 = vld [vmem:[#allocation5 + $0x10] sm:$0xff]  ;;  %v236_v17 = vlaneseq }
  0x34   :  { %272 = vmatprep.subr.mxu0 %v413_v0  ;;  %283 = vmatprep.subr.mxu1 %v413_v0  ;;  %v150_v3 = vld [vmem:[#allocation8 + $0x8] sm:$0xff]  ;;  %v72_v4 = vld [vmem:[#allocation5 + $0x8] sm:$0xff]  ;;  %v70_v6 = vld [vmem:[#allocation7] sm:$0xff]  ;;  %vm151_vm1 = vcmask 130048   ;;  %vm75_vm2 = vcmask 261120   ;;  %s415_s2 = smov [#allocation10]  }
  0x35   :  { %280 = vmatprep.mubr.msk.f32.mxu0 %vm414_vm0, %v413_v0  ;;  %287 = vmatprep.mubr.msk.f32.mxu1 %vm414_vm0, %v413_v0  ;;  %v149_v5 = vld [vmem:[#allocation8] sm:$0xff]  ;;  %v71_v7 = vld [vmem:[#allocation5] sm:$0xff]  ;;  %v69_v8 = vld [vmem:[#allocation2] sm:$0xff]  ;;  %v237_v19 = vand.u32 127, %v236_v17  ;;  %v239_v20 = vshrl.u32 %v236_v17, 7  ;;  %s251_s3 = sshll.u32 %s415_s2, 4  ;;  %s252_s3 = int_to_ptr.vmem [resolvable:$true] %s251_s3 }
  0x36   :  { %273 = vmatpush3.msra.mxu0 %v74_v1  ;;  %284 = vmatpush3.msra.mxu1 %v150_v3  ;;  %vm243_vm3 = vcmask 57344   ;;  %s379_s9 = scalar_lea.vmem %s252_s3, 16  ;;  %s383_s10 = scalar_lea.vmem %s252_s3, 32 }
  0x37   :  { %274 = vmatprep.subr.mxu0 %v413_v0  ;;  %285 = vmatprep.subr.mxu1 %v413_v0  ;;  %v240_v22 = vsub.s32 %v237_v19, %v239_v20  ;;  %p380_p6 = scmp.ne.s32.totalorder %s252_s3, %s379_s9  ;;  %p384_p7 = scmp.lt.s32.totalorder %s252_s3, %s252_s3 }
  0x38   :  { %275 = vmatpush3.msra.mxu0 %v73_v2  ;;  %286 = vmatpush3.msra.mxu1 %v149_v5  ;;  %p385_p8 = scmp.lt.s32.totalorder %s383_s10, %s379_s9 }
  0x39   :  { %276 = vmatprep.subr.mxu0 %v413_v0  ;;  %288 = vmatmul.mubr.msk.f32.vlgmr.msra.gmra.mxu1 %vm151_vm1, %v70_v6 }
  0x3a   :  { %277 = vmatpush3.msra.mxu0 %v72_v4  ;;  %p386_p9 = por %p385_p8, %p384_p7 }
  0x3b   :  { %278 = vmatprep.subr.mxu0 %v413_v0 }
  0x3c   :  { %279 = vmatpush3.msra.mxu0 %v71_v7  ;;  %p387_p10 = pnand %p386_p9, %p380_p6 }
  0x3d   :  { %281 = vmatmul.mubr.msk.f32.vlgmr.msra.gmra.mxu0 %vm75_vm2, %v69_v8 }
  0xf9   :  { %v221_v9 = vpop.f32.mrf.mxu1 }
  0xfa   :  { %v229_v13 = vmul.f32 %v221_v9, %v70_v6 }
  0xfb   :  { %v289_v10 = vpop.f32.mrf.mxu1 }
  0xfc   :  { %v230_v16 = vsel %vm151_vm1, %v229_v13, 0.0 }
  0xfd   :  { %v145_v11 = vpop.f32.mrf.mxu0 }
  0xfe   :  { %v225_v12 = vmul.f32 %v145_v11, %v69_v8 }
  0xff   :  { %v282_v14 = vpop.f32.mrf.mxu0 }
 0x100   :  { %v226_v15 = vsel %vm75_vm2, %v225_v12, 0.0 }
 0x101   :  { %227 = vadd.xlane.f32.xlu0 %v226_v15 }
 0x105   :  { %231 = vadd.xlane.f32.xlu0 %v230_v16 }
 0x18a   :  { %v228_v18 = vpop.xlane.xlu0 %227 }
 0x18e   :  { %v232_v21 = vpop.xlane.xlu0 %231 }
 0x18f   :  { %v233_v23 = vadd.f32 %v232_v21, %v228_v18 }
 0x191   :  { %v234_v24 = vmul.f32 0.1, %v233_v23 }
 0x193   :  { %v241_v25 = vrot.slane %v234_v24, %v240_v22 }
 0x195   :  { %244 = vst.msk [vmem:[#allocation10] sm:$0x1] %vm243_vm3, %v241_v25 }
 0x196   :  { %390 = shalt.err (!%p387_p10)
}
 0x197   :  { %254 = dma.vmem_to_hbm [thread:$0]  %s252_s3, 16, %s468_s4, [#allocation4]  }
 0x198   :  { %405 = dma.done.wait [#allocation4], 16  }
 0x199   :  { %406 = vsyncadd [#allocation4], 4294967280 }
 0x19a   :  { %258 = vsyncpa [#allocation3], 1 }
 0x19b   :  { %259 = vsyncpa [#allocation6], 1 }
 0x19c   :  { %260 = vsyncpa [#allocation9], 1 }
 0x19d   :  { %261 = vsyncpa [#allocation4], 1 }

</bundles_post_ra>
